<compile_context>
chip_gen: v5e
topology: v5e:2x2
jax: 0.10.0
libtpu: 0.0.40
codegen_flags: <defaults>
</compile_context>

<pallas_src>
import functools
import math

import jax
import jax.numpy as jnp
from jax.experimental import pallas as pl
from jax.experimental.pallas import tpu as pltpu


def _round_up(x: int, m: int) -> int:
    return ((x + m - 1) // m) * m


@functools.lru_cache(maxsize=1)
def _vmem_config():
    """Generation-aware (tile_budget, vmem_limit) in bytes.

    128 MiB VMEM (v5e/v6e) -> budget 96 MiB, limit 112 MiB.
     64 MiB VMEM (v7x)     -> budget 48 MiB, limit  56 MiB.
    Falls back to the conservative v7x numbers if the query fails.
    """
    try:
        capacity = int(getattr(pltpu.get_tpu_info(), "vmem_capacity_bytes", 0))
    except Exception:
        capacity = 0
    if capacity <= 0:
        capacity = 64 * 1024 * 1024
    return (capacity * 3) // 4, (capacity * 7) // 8


def _choose_tiles(M, D, E, *, x_itemsize, w_itemsize, out_itemsize,
                  out_is_f32, budget):
    """Pick (tm, te) under the VMEM budget.

    Preference order:
      1. Weights-resident fast path (te == E_pad): W1/W2 are DMA'd from HBM
         exactly once, independent of M (requires tm >= 256 so the MXU stays
         well fed).
      2. Stream weight tiles along E with the largest tm that fits: weights
         are re-read M/tm times, so bigger tm directly cuts the dominant HBM
         term.
    Tiles are MXU-aligned multiples of 128 (preferring 256 multiples); full
    extents are used only when the dimension is smaller than that.
    """
    Mp8 = _round_up(max(M, 1), 8)
    Ep = _round_up(max(E, 1), 128)

    def fits(tm, te):
        v = (2 * tm * D * x_itemsize          # x tile (double-buffered)
             + 2 * D * te * w_itemsize        # W1 tile
             + 2 * te * D * w_itemsize        # W2 tile
             + 2 * 8 * te * 4                 # b1 tile (f32, sublane-padded)
             + 2 * 8 * D * 4                  # b2 tile (f32)
             + 2 * tm * D * out_itemsize)     # output tile
        if te < Ep and not out_is_f32:
            v += tm * D * 4                   # f32 scratch accumulator
        return v <= budget

    tm_cands = [t for t in (1024, 768, 512, 384, 256, 128) if t <= Mp8] or [Mp8]

    # 1) Weights-resident fast path.
    resident_min_tm = min(256, tm_cands[0])
    for tm in tm_cands:
        if tm < resident_min_tm:
            break
        if fits(tm, Ep):
            return tm, Ep

    # 2) Stream weight tiles along the expansion axis.
    te_cands = [t for t in (2048, 1024, 512, 256, 128) if t <= Ep] or [Ep]
    for tm in tm_cands:
        for te in te_cands:
            if fits(tm, te):
                return tm, te
    return tm_cands[-1], te_cands[-1]


# --------------------------------------------------------------------------
# Kernels.  Biases are float32; weights are in the compute dtype; x is cast
# to the compute dtype per-tile inside the kernel (no wrapper pass over x).
# --------------------------------------------------------------------------

def _ffn_kernel_single(x_ref, w1_ref, b1_ref, w2_ref, b2_ref, o_ref):
    """Single expansion tile (weights resident): no accumulator needed."""
    x = x_ref[...].astype(w1_ref.dtype)
    h = jnp.dot(x, w1_ref[...], preferred_element_type=jnp.float32)
    h = jnp.maximum(h + b1_ref[...], 0.0)
    out = jnp.dot(h.astype(w2_ref.dtype), w2_ref[...],
                  preferred_element_type=jnp.float32)
    o_ref[...] = (out + b2_ref[...]).astype(o_ref.dtype)


def _ffn_kernel_acc_inplace(x_ref, w1_ref, b1_ref, w2_ref, b2_ref, o_ref):
    """Streaming E tiles, float32 output: accumulate directly into o_ref
    (resident across the e axis), so no f32 VMEM scratch is needed."""
    e = pl.program_id(1)

    @pl.when(e == 0)
    def _():
        # Fold the layer-2 bias into the accumulator init.
        o_ref[...] = jnp.broadcast_to(b2_ref[...], o_ref.shape)

    x = x_ref[...].astype(w1_ref.dtype)
    h = jnp.dot(x, w1_ref[...], preferred_element_type=jnp.float32)
    h = jnp.maximum(h + b1_ref[...], 0.0)
    o_ref[...] += jnp.dot(h.astype(w2_ref.dtype), w2_ref[...],
                          preferred_element_type=jnp.float32)


def _ffn_kernel_acc(x_ref, w1_ref, b1_ref, w2_ref, b2_ref, o_ref, acc_ref):
    """Streaming E tiles, non-f32 output: f32 scratch accumulator."""
    e = pl.program_id(1)

    @pl.when(e == 0)
    def _():
        acc_ref[...] = jnp.broadcast_to(b2_ref[...], acc_ref.shape)

    x = x_ref[...].astype(w1_ref.dtype)
    h = jnp.dot(x, w1_ref[...], preferred_element_type=jnp.float32)
    h = jnp.maximum(h + b1_ref[...], 0.0)
    acc_ref[...] += jnp.dot(h.astype(w2_ref.dtype), w2_ref[...],
                            preferred_element_type=jnp.float32)

    @pl.when(e == pl.num_programs(1) - 1)
    def _():
        o_ref[...] = acc_ref[...].astype(o_ref.dtype)


# --------------------------------------------------------------------------
# Wrapper.
# --------------------------------------------------------------------------

def prepare_feed_forward_params(w1, b1, w2, b2, compute_dtype=jnp.bfloat16):
    """Pre-cast weights to the kernel compute dtype OUTSIDE the hot path.

    Biases stay float32 (tiny; avoids double rounding through bf16).  Passing
    the result to feed_forward makes the wrapper casts no-ops.
    """
    cd = jnp.dtype(compute_dtype)
    return (jnp.asarray(w1, cd), jnp.asarray(b1, jnp.float32),
            jnp.asarray(w2, cd), jnp.asarray(b2, jnp.float32))


@functools.partial(jax.jit, static_argnames=("tm", "te", "compute_dtype"))
def feed_forward(inputs, w1, b1, w2, b2, *, tm=None, te=None,
                 compute_dtype=jnp.bfloat16):
    """FeedForward forward pass.

    inputs: [batch, seq, model_dim]
    w1: [model_dim, expansion_dim]   b1: [expansion_dim]
    w2: [expansion_dim, model_dim]   b2: [model_dim]
    returns: [batch, seq, model_dim] in inputs.dtype.
    """
    batch, seq, D = inputs.shape
    E = w1.shape[1]
    M = batch * seq
    out_dtype = inputs.dtype
    cd = jnp.dtype(compute_dtype)
    out_is_f32 = jnp.dtype(out_dtype) == jnp.float32

    budget, vmem_limit = _vmem_config()

    tm_auto = tm is None
    if tm is None or te is None:
        tm_sel, te_sel = _choose_tiles(
            M, D, E,
            x_itemsize=jnp.dtype(inputs.dtype).itemsize,
            w_itemsize=cd.itemsize,
            out_itemsize=jnp.dtype(out_dtype).itemsize,
            out_is_f32=out_is_f32,
            budget=budget)
        if tm is None:
            tm = tm_sel
        if te is None:
            te = te_sel

    E_pad = _round_up(E, te)
    n_e = E_pad // te

    # Megacore (v7x has 2 TensorCores): in the weights-resident path splitting
    # M is free (weights are DMA'd once regardless), so make sure the
    # "parallel" axis has at least 2 tiles for core sharding.
    if tm_auto and n_e == 1 and M >= 512 and _round_up(M, tm) // tm == 1:
        tm = _round_up((M + 1) // 2, 128)

    M_pad = _round_up(M, tm)
    n_m = M_pad // tm

    # --- Prepare operands (all of these are no-ops when the caller already
    # --- passes pre-cast weights / aligned shapes). ---
    x2d = inputs.reshape(M, D)                       # original dtype, no cast
    if M_pad != M:
        x2d = jnp.pad(x2d, ((0, M_pad - M), (0, 0)))

    w1c = w1 if w1.dtype == cd else w1.astype(cd)
    w2c = w2 if w2.dtype == cd else w2.astype(cd)
    b1c = b1.astype(jnp.float32).reshape(1, E)
    b2c = b2.astype(jnp.float32).reshape(1, D)
    if E_pad != E:
        w1c = jnp.pad(w1c, ((0, 0), (0, E_pad - E)))
        b1c = jnp.pad(b1c, ((0, 0), (0, E_pad - E)))
        w2c = jnp.pad(w2c, ((0, E_pad - E), (0, 0)))

    if n_e == 1:
        kernel = _ffn_kernel_single
        grid = (n_m,)
        dims = ("parallel",)
        in_specs = [
            pl.BlockSpec((tm, D), lambda i: (i, 0)),
            pl.BlockSpec((D, E_pad), lambda i: (0, 0)),
            pl.BlockSpec((1, E_pad), lambda i: (0, 0)),
            pl.BlockSpec((E_pad, D), lambda i: (0, 0)),
            pl.BlockSpec((1, D), lambda i: (0, 0)),
        ]
        out_spec = pl.BlockSpec((tm, D), lambda i: (i, 0))
        scratch = []
    else:
        grid = (n_m, n_e)
        dims = ("parallel", "arbitrary")
        in_specs = [
            pl.BlockSpec((tm, D), lambda i, e: (i, 0)),
            pl.BlockSpec((D, te), lambda i, e: (0, e)),
            pl.BlockSpec((1, te), lambda i, e: (0, e)),
            pl.BlockSpec((te, D), lambda i, e: (e, 0)),
            pl.BlockSpec((1, D), lambda i, e: (0, 0)),
        ]
        out_spec = pl.BlockSpec((tm, D), lambda i, e: (i, 0))
        if out_is_f32:
            kernel = _ffn_kernel_acc_inplace
            scratch = []
        else:
            kernel = _ffn_kernel_acc
            scratch = [pltpu.VMEM((tm, D), jnp.float32)]

    flops = 4 * M * D * E  # two matmuls
    w_reads = 1 if n_e == 1 else n_m
    bytes_accessed = int(
        M_pad * D * jnp.dtype(inputs.dtype).itemsize
        + (w1c.size + w2c.size) * cd.itemsize * w_reads
        + (b1c.size + b2c.size) * 4
        + M_pad * D * jnp.dtype(out_dtype).itemsize
    )

    out2d = pl.pallas_call(
        kernel,
        out_shape=jax.ShapeDtypeStruct((M_pad, D), out_dtype),
        grid_spec=pltpu.PrefetchScalarGridSpec(
            num_scalar_prefetch=0,
            grid=grid,
            in_specs=in_specs,
            out_specs=out_spec,
            scratch_shapes=scratch,
        ),
        compiler_params=pltpu.CompilerParams(
            dimension_semantics=dims,
            vmem_limit_bytes=vmem_limit,
        ),
        cost_estimate=pl.CostEstimate(
            flops=flops, transcendentals=0, bytes_accessed=bytes_accessed
        ),
    )(x2d, w1c, b1c, w2c, b2c)

    return out2d[:M].reshape(batch, seq, D)


# --------------------------------------------------------------------------
# Init / reference / tests.
# --------------------------------------------------------------------------

def init_feed_forward_params(key, model_dim, expansion_dim, dtype=jnp.float32):
    """Deterministic init matching nn.Linear's U(-1/sqrt(in), 1/sqrt(in))."""
    k1, k2, k3, k4 = jax.random.split(key, 4)
    bound1 = 1.0 / math.sqrt(model_dim)
    bound2 = 1.0 / math.sqrt(expansion_dim)
    # Stored as (in, out) = transpose of PyTorch nn.Linear's (out, in).
    w1 = jax.random.uniform(k1, (model_dim, expansion_dim), dtype=dtype,
                            minval=-bound1, maxval=bound1)
    b1 = jax.random.uniform(k2, (expansion_dim,), dtype=dtype,
                            minval=-bound1, maxval=bound1)
    w2 = jax.random.uniform(k3, (expansion_dim, model_dim), dtype=dtype,
                            minval=-bound2, maxval=bound2)
    b2 = jax.random.uniform(k4, (model_dim,), dtype=dtype,
                            minval=-bound2, maxval=bound2)
    return w1, b1, w2, b2


def _reference(inputs, w1, b1, w2, b2, compute_dtype):
    """Plain-JAX reference with the same cast/accumulation structure."""
    cd = jnp.dtype(compute_dtype)
    x = inputs.astype(cd)
    h = jnp.dot(x, w1.astype(cd), preferred_element_type=jnp.float32)
    h = jnp.maximum(h + b1.astype(jnp.float32), 0.0)
    out = jnp.dot(h.astype(cd), w2.astype(cd),
                  preferred_element_type=jnp.float32)
    out = out + b2.astype(jnp.float32)
    return out.astype(inputs.dtype)


if __name__ == "__main__":
    key = jax.random.PRNGKey(0)
    k_in1, k_p1, k_in2 = jax.random.split(key, 3)

    # --- Test 1: small shapes, f32 compute path (weights-resident branch). ---
    batch, seq, model_dim, expansion_dim = 2, 8, 32, 64
    inputs = jax.random.normal(k_in1, (batch, seq, model_dim), dtype=jnp.float32)
    w1, b1, w2, b2 = init_feed_forward_params(k_p1, model_dim, expansion_dim)

    out = feed_forward(inputs, w1, b1, w2, b2, compute_dtype=jnp.float32)
    out = jax.block_until_ready(out)
    ref = _reference(inputs, w1, b1, w2, b2, jnp.float32)
    assert out.shape == (batch, seq, model_dim)
    assert jnp.allclose(out, ref, atol=1e-3, rtol=1e-3)

    # --- Test 2: bf16 compute, padded M (seq=5), forced multi-tile reduction,
    # --- f32 output -> in-place (no-scratch) accumulator branch. ---
    batch2, seq2, model_dim2, expansion_dim2 = 2, 5, 128, 256
    inputs2 = jax.random.normal(k_in2, (batch2, seq2, model_dim2),
                                dtype=jnp.float32)
    w1b, b1b, w2b, b2b = init_feed_forward_params(
        jax.random.PRNGKey(1), model_dim2, expansion_dim2)

    out2 = feed_forward(inputs2, w1b, b1b, w2b, b2b, te=128,
                        compute_dtype=jnp.bfloat16)
    out2 = jax.block_until_ready(out2)
    ref2 = _reference(inputs2, w1b, b1b, w2b, b2b, jnp.bfloat16)
    assert out2.shape == (batch2, seq2, model_dim2)
    assert jnp.allclose(out2, ref2, atol=2e-2, rtol=2e-2)

    # --- Test 3: bf16 inputs + pre-cast weights (no wrapper cast passes),
    # --- bf16 output -> scratch-accumulator branch. ---
    inputs3 = inputs2.astype(jnp.bfloat16)
    w1p, b1p, w2p, b2p = prepare_feed_forward_params(
        w1b, b1b, w2b, b2b, compute_dtype=jnp.bfloat16)
    out3 = feed_forward(inputs3, w1p, b1p, w2p, b2p, te=128,
                        compute_dtype=jnp.bfloat16)
    out3 = jax.block_until_ready(out3)
    ref3 = _reference(inputs3, w1b, b1b, w2b, b2b, jnp.bfloat16)
    assert out3.shape == (batch2, seq2, model_dim2)
    assert jnp.allclose(out3.astype(jnp.float32), ref3.astype(jnp.float32),
                        atol=3e-2, rtol=3e-2)

    print("KERNEL_OK")
</pallas_src>

<mosaic_0001>
module attributes {stable_mosaic.version = 11 : i64} {
  func.func @_ffn_kernel_single(%arg0: i32, %arg1: memref<16x32xf32, #tpu.memory_space<vmem>>, %arg2: memref<32x128xf32, #tpu.memory_space<vmem>>, %arg3: memref<1x128xf32, #tpu.memory_space<vmem>>, %arg4: memref<128x32xf32, #tpu.memory_space<vmem>>, %arg5: memref<1x32xf32, #tpu.memory_space<vmem>>, %arg6: memref<16x32xf32, #tpu.memory_space<vmem>>) attributes {dimension_semantics = [#tpu.dimension_semantics<parallel>], iteration_bounds = array<i64: 1>, scalar_prefetch = 0 : i64, scratch_operands = 0 : i64, tpu.core_type = #tpu.core_type<tc>, window_params = [{transform_indices = @transform_0, window_bounds = array<i64: 16, 32>}, {pipeline_mode = #tpu.pipeline_mode<synchronous>, transform_indices = @transform_1, window_bounds = array<i64: 32, 128>}, {pipeline_mode = #tpu.pipeline_mode<synchronous>, transform_indices = @transform_2, window_bounds = array<i64: 1, 128>}, {pipeline_mode = #tpu.pipeline_mode<synchronous>, transform_indices = @transform_3, window_bounds = array<i64: 128, 32>}, {pipeline_mode = #tpu.pipeline_mode<synchronous>, transform_indices = @transform_4, window_bounds = array<i64: 1, 32>}, {transform_indices = @transform_5, window_bounds = array<i64: 16, 32>}]} {
    %c0 = arith.constant 0 : index
    %c0_0 = arith.constant 0 : index
    %0 = vector.load %arg1[%c0, %c0_0] : memref<16x32xf32, #tpu.memory_space<vmem>>, vector<16x32xf32>
    %c0_1 = arith.constant 0 : index
    %c0_2 = arith.constant 0 : index
    %1 = vector.load %arg2[%c0_1, %c0_2] : memref<32x128xf32, #tpu.memory_space<vmem>>, vector<32x128xf32>
    %cst = arith.constant dense<0.000000e+00> : vector<16x128xf32>
    %2 = tpu.matmul %0, %1, %cst {dimension_numbers = #tpu.dot_dimension_numbers<[1], [0], [0], [1], [0, 0, 1, 1], [], []>} : vector<16x32xf32>, vector<32x128xf32>, vector<16x128xf32> -> vector<16x128xf32>
    %c0_3 = arith.constant 0 : index
    %c0_4 = arith.constant 0 : index
    %3 = vector.load %arg3[%c0_3, %c0_4] : memref<1x128xf32, #tpu.memory_space<vmem>>, vector<1x128xf32>
    %4 = vector.broadcast %3 : vector<1x128xf32> to vector<16x128xf32>
    %5 = arith.addf %2, %4 : vector<16x128xf32>
    %cst_5 = arith.constant 0.000000e+00 : f32
    %6 = vector.broadcast %cst_5 : f32 to vector<16x128xf32>
    %7 = arith.maximumf %5, %6 : vector<16x128xf32>
    %c0_6 = arith.constant 0 : index
    %c0_7 = arith.constant 0 : index
    %8 = vector.load %arg4[%c0_6, %c0_7] : memref<128x32xf32, #tpu.memory_space<vmem>>, vector<128x32xf32>
    %cst_8 = arith.constant dense<0.000000e+00> : vector<16x32xf32>
    %9 = tpu.matmul %7, %8, %cst_8 {dimension_numbers = #tpu.dot_dimension_numbers<[1], [0], [0], [1], [0, 0, 1, 1], [], []>} : vector<16x128xf32>, vector<128x32xf32>, vector<16x32xf32> -> vector<16x32xf32>
    %c0_9 = arith.constant 0 : index
    %c0_10 = arith.constant 0 : index
    %10 = vector.load %arg5[%c0_9, %c0_10] : memref<1x32xf32, #tpu.memory_space<vmem>>, vector<1x32xf32>
    %11 = vector.broadcast %10 : vector<1x32xf32> to vector<16x32xf32>
    %12 = arith.addf %9, %11 : vector<16x32xf32>
    %c0_11 = arith.constant 0 : index
    %c0_12 = arith.constant 0 : index
    %13 = vector.load %arg6[%c0_11, %c0_12] : memref<16x32xf32, #tpu.memory_space<vmem>>, vector<16x32xf32>
    tpu.vector_store %arg6[%c0_11, %c0_12], %12 {strides = array<i32>} : memref<16x32xf32, #tpu.memory_space<vmem>>, vector<16x32xf32>,
    return
  }
  func.func @transform_0(%arg0: i32) -> (i32, i32) {
    %c0_i32 = arith.constant 0 : i32
    %c0_i32_0 = arith.constant 0 : i32
    return %arg0, %c0_i32 : i32, i32
  }
  func.func @transform_1(%arg0: i32) -> (i32, i32) {
    %c0_i32 = arith.constant 0 : i32
    %c0_i32_0 = arith.constant 0 : i32
    %c0_i32_1 = arith.constant 0 : i32
    return %c0_i32, %c0_i32_0 : i32, i32
  }
  func.func @transform_2(%arg0: i32) -> (i32, i32) {
    %c0_i32 = arith.constant 0 : i32
    %c0_i32_0 = arith.constant 0 : i32
    %c0_i32_1 = arith.constant 0 : i32
    return %c0_i32, %c0_i32_0 : i32, i32
  }
  func.func @transform_3(%arg0: i32) -> (i32, i32) {
    %c0_i32 = arith.constant 0 : i32
    %c0_i32_0 = arith.constant 0 : i32
    %c0_i32_1 = arith.constant 0 : i32
    return %c0_i32, %c0_i32_0 : i32, i32
  }
  func.func @transform_4(%arg0: i32) -> (i32, i32) {
    %c0_i32 = arith.constant 0 : i32
    %c0_i32_0 = arith.constant 0 : i32
    %c0_i32_1 = arith.constant 0 : i32
    return %c0_i32, %c0_i32_0 : i32, i32
  }
  func.func @transform_5(%arg0: i32) -> (i32, i32) {
    %c0_i32 = arith.constant 0 : i32
    %c0_i32_0 = arith.constant 0 : i32
    return %arg0, %c0_i32 : i32, i32
  }
}

</mosaic_0001>

<bundles_post_ra>
// kernel: feed_forward.1
= control target key start
LH: loop header
LB: loop body
LE: loop exit
PB: predicated region body
PF: predicated region fallthrough
CT: control target
= control target key end

     0   :  { %vm31_vm0 = vcmask 261120   ;;  %s287_s0 = inlined_call_operand.vmem [shape: f32[16,32], index: 0, kind: input, shape index: {}]   ;;  %s288_s1 = inlined_call_operand.vmem [shape: f32[32,128], index: 1, kind: input, shape index: {}]   ;;  %s289_s2 = inlined_call_operand.vmem [shape: f32[1,128], index: 2, kind: input, shape index: {}]   ;;  %s290_s3 = inlined_call_operand.vmem [shape: f32[128,32], index: 3, kind: input, shape index: {}]   ;;  %s291_s4 = inlined_call_operand.vmem [shape: f32[1,32], index: 4, kind: input, shape index: {}]   ;;  %s292_s5 = inlined_call_operand.hbm [shape: f32[16,32], index: 5, kind: output, shape index: {}]  }
   0x1   :  { %v26_v0 = vld [vmem:[%s288_s1 + $0x18] sm:$0xff]  ;;  %v25_v1 = vld [vmem:[%s288_s1 + $0x10] sm:$0xff]  ;;  %v24_v2 = vld [vmem:[%s288_s1 + $0x8] sm:$0xff] }
   0x2   :  { %50 = vmatpush.msra.mxu0 %v26_v0  ;;  %v78_v3 = vld [vmem:[%s290_s3 + $0x78] sm:$0xff]  ;;  %v77_v4 = vld [vmem:[%s290_s3 + $0x70] sm:$0xff]  ;;  %v23_v5 = vld [vmem:[%s288_s1] sm:$0xff] }
   0x3   :  { %83 = vmatpush.msra.mxu1 %v78_v3  ;;  %v76_v6 = vld [vmem:[%s290_s3 + $0x68] sm:$0xff]  ;;  %128 = vmatpush.msra.mxu2 %v78_v3  ;;  %v21_v7 = vld [vmem:[%s287_s0] sm:$0xff] }
   0x4   :  { %51 = vmatpush.msra.mxu0 %v25_v1  ;;  %v75_v8 = vld [vmem:[%s290_s3 + $0x60] sm:$0xff] }
   0x5   :  { %84 = vmatpush.msra.mxu1 %v77_v4  ;;  %129 = vmatpush.msra.mxu2 %v77_v4 }
   0x6   :  { %52 = vmatpush.msra.mxu0 %v24_v2 }
   0x7   :  { %85 = vmatpush.msra.mxu1 %v76_v6 }
   0x8   :  { %53 = vmatpush.msra.mxu0 %v23_v5 }
   0x9   :  { %10 = vsyncpa [#allocation3], 0  ;;  %126 = vmatmul.msk.f32.vlgmr.msra.gmra.mxu0 %vm31_vm0, %v21_v7  ;;  %v74_v9 = vld [vmem:[%s290_s3 + $0x58] sm:$0xff]  ;;  %130 = vmatpush.msra.mxu2 %v76_v6  ;;  %v73_v10 = vld [vmem:[%s290_s3 + $0x50] sm:$0xff]  ;;  %s114_s15 = sshll.u32 %s292_s5, 4  ;;  %s176_s16 = smov 128   ;;  %s115_s15 = int_to_ptr.hbm [resolvable:$true] %s114_s15 }
   0xa   :  { %86 = vmatpush.msra.mxu1 %v75_v8  ;;  %v72_v11 = vld [vmem:[%s290_s3 + $0x48] sm:$0xff]  ;;  %v71_v13 = vld [vmem:[%s290_s3 + $0x40] sm:$0xff]  ;;  %v70_v14 = vld [vmem:[%s290_s3 + $0x38] sm:$0xff]  ;;  %s177_s17 = smov 8  }
   0xb   :  { %131 = vmatpush.msra.mxu2 %v75_v8  ;;  %v22_v12 = vld [vmem:[%s287_s0 + $0x8] sm:$0xff]  ;;  %v69_v15 = vld [vmem:[%s290_s3 + $0x30] sm:$0xff]  ;;  %v67_v17 = vld [vmem:[%s290_s3 + $0x20] sm:$0xff] }
   0xc   :  { %87 = vmatpush.msra.mxu1 %v74_v9  ;;  %v68_v16 = vld [vmem:[%s290_s3 + $0x28] sm:$0xff]  ;;  %v66_v18 = vld [vmem:[%s290_s3 + $0x18] sm:$0xff]  ;;  %v65_v19 = vld [vmem:[%s290_s3 + $0x10] sm:$0xff] }
   0xd   :  { %132 = vmatpush.msra.mxu2 %v74_v9  ;;  %v64_v20 = vld [vmem:[%s290_s3 + $0x8] sm:$0xff]  ;;  %v63_v21 = vld [vmem:[%s290_s3] sm:$0xff]  ;;  %s175_s3 = smov [#allocation2]  }
   0xe   :  { %88 = vmatpush.msra.mxu1 %v73_v10  ;;  %v147_v22 = vld [vmem:[%s289_s2] ss:$0 sm:$0xff]  ;;  %s112_s13 = sshll.u32 %s175_s3, 4  ;;  %s113_s13 = int_to_ptr.vmem [resolvable:$true] %s112_s13 }
   0xf   :  { %133 = vmatpush.msra.mxu2 %v73_v10  ;;  %v148_v29 = vld [vmem:[%s291_s4] ss:$0 sm:$0xff] }
  0x10   :  { %89 = vmatpush.msra.mxu1 %v72_v11 }
  0x11   :  { %127 = vmatmul.msk.f32.gmra.mxu0 %vm31_vm0, %v22_v12  ;;  %134 = vmatpush.msra.mxu2 %v72_v11 }
  0x12   :  { %90 = vmatpush.msra.mxu1 %v71_v13 }
  0x13   :  { %135 = vmatpush.msra.mxu2 %v71_v13 }
  0x14   :  { %91 = vmatpush.msra.mxu1 %v70_v14 }
  0x15   :  { %136 = vmatpush.msra.mxu2 %v70_v14 }
  0x16   :  { %92 = vmatpush.msra.mxu1 %v69_v15 }
  0x17   :  { %137 = vmatpush.msra.mxu2 %v69_v15 }
  0x18   :  { %93 = vmatpush.msra.mxu1 %v68_v16 }
  0x19   :  { %138 = vmatpush.msra.mxu2 %v68_v16 }
  0x1a   :  { %94 = vmatpush.msra.mxu1 %v67_v17 }
  0x1b   :  { %139 = vmatpush.msra.mxu2 %v67_v17 }
  0x1c   :  { %95 = vmatpush.msra.mxu1 %v66_v18 }
  0x1d   :  { %140 = vmatpush.msra.mxu2 %v66_v18 }
  0x1e   :  { %96 = vmatpush.msra.mxu1 %v65_v19 }
  0x1f   :  { %141 = vmatpush.msra.mxu2 %v65_v19 }
  0x20   :  { %97 = vmatpush.msra.mxu1 %v64_v20 }
  0x21   :  { %142 = vmatpush.msra.mxu2 %v64_v20 }
  0x22   :  { %98 = vmatpush.msra.mxu1 %v63_v21 }
  0x23   :  { %143 = vmatpush.msra.mxu2 %v63_v21 }
  0x86   :  { %v55_v23 = vpop.f32.mrf.mxu0 }
  0x87   :  { %v56_v24 = vadd.f32 %v147_v22, %v55_v23 }
  0x89   :  { %v61_v25 = vmax.f32 %v56_v24, 0.0 }
  0x8b   :  { %99 = vmatmul.f32.vlgmr.msra.gmra.mxu1 %v61_v25 }
  0x8e   :  { %v58_v26 = vpop.f32.mrf.mxu0 }
  0x8f   :  { %v59_v27 = vadd.f32 %v147_v22, %v58_v26 }
  0x91   :  { %v62_v28 = vmax.f32 %v59_v27, 0.0 }
  0x93   :  { %102 = vmatmul.f32.vlgmr.msra.gmra.mxu2 %v62_v28 }
 0x108   :  { %v100_v30 = vpop.f32.mrf.mxu1 }
 0x109   :  { %v101_v31 = vadd.f32 %v148_v29, %v100_v30 }
 0x10b   :  { %106 = vst.msk [vmem:[#allocation2] sm:$0xff] %vm31_vm0, %v101_v31 }
 0x116   :  { %v103_v32 = vpop.f32.mrf.mxu2 }
 0x117   :  { %v104_v33 = vadd.f32 %v148_v29, %v103_v32 }
 0x119   :  { %107 = vst.msk [vmem:[#allocation2 + $0x8] sm:$0xff] %vm31_vm0, %v104_v33 }
 0x11a   :  { %120 = dma.vmem_to_hbm [thread:$0]  %s113_s13, 256, %s115_s15, [#allocation3], %s176_s16, %s176_s16, %s177_s17  }
 0x11b   :  { %173 = dma.done.wait [#allocation3], 256  }
 0x11c   :  { %174 = vsyncadd [#allocation3], 4294967040 }
 0x11d   :  { %125 = vsyncpa [#allocation3], 1 }

</bundles_post_ra>
